<compile_context>
chip_gen: v7x
topology: tpu7x:2x2x1
jax: 0.10.0
libtpu: 0.0.40
codegen_flags: <defaults>
</compile_context>

<pallas_src>
import functools

import jax
import jax.numpy as jnp
from jax.experimental import pallas as pl
from jax.experimental.pallas import tpu as pltpu

_LANE = 128
_SUBLANE = 8


def _round_up(x, m):
    return (x + m - 1) // m * m


# ---------------------------------------------------------------------------
# Kernels
# ---------------------------------------------------------------------------
def _fc_flatten_kernel(x_ref, w_ref, b_ref, out_ref, acc_ref):
    """out[i_tile] = sum_k x[i_tile, k_tile] @ w[k_tile] + b  (grid axis 1 = K)."""
    k = pl.program_id(1)

    @pl.when(k == 0)
    def _init():
        acc_ref[...] = jnp.zeros_like(acc_ref)

    acc_ref[...] += jnp.dot(x_ref[...], w_ref[...],
                            preferred_element_type=jnp.float32)

    @pl.when(k == pl.num_programs(1) - 1)
    def _finalize():
        out_ref[...] = (acc_ref[...] + b_ref[...]).astype(out_ref.dtype)


def _fc_mean_kernel(x_ref, w_ref, b_ref, out_ref, *, inv_tokens):
    """out = mean_t(x[:, t, :]) @ w + b for one batch tile."""
    # Reduce over the token axis in f32, then one MXU matmul against the
    # resident weight slab; bias add stays in f32.
    pooled = jnp.sum(x_ref[...].astype(jnp.float32), axis=1) * inv_tokens     # [TB, E]
    out = jnp.dot(pooled.astype(w_ref.dtype), w_ref[...],
                  preferred_element_type=jnp.float32) + b_ref[...]
    out_ref[...] = out.astype(out_ref.dtype)


# ---------------------------------------------------------------------------
# Wrapper
# ---------------------------------------------------------------------------
def fc_classifier_forward(x, weight, bias, *, preprocess="flatten",
                          use_bf16=True, tb=128, tk=1280):
    """Pallas forward of fc_classifier.

    x:      [B, token_num, emb_dim] float32
    weight: [num_classes, input_dim]   (PyTorch nn.Linear layout)
    bias:   [num_classes]
    returns logits [B, num_classes] float32
    """
    B, T, E = x.shape
    C = weight.shape[0]
    mm_dtype = jnp.bfloat16 if use_bf16 else jnp.float32

    # Lane-dense output: pad the class axis to a multiple of 128 (zero columns).
    Cp = _round_up(C, _LANE)
    w = jnp.pad(jnp.transpose(weight), ((0, 0), (0, Cp - C)))                 # [K, Cp]
    b = jnp.pad(bias, (0, Cp - C)).reshape(1, Cp).astype(jnp.float32)

    # Batch tile: sublane-aligned and guaranteed to divide the padded batch.
    tb = max(_SUBLANE, min(_round_up(tb, _SUBLANE), _round_up(B, _SUBLANE)))
    Bp = _round_up(B, tb)

    if preprocess == "flatten":
        K = T * E
        assert weight.shape[1] == K, (weight.shape, K)
        tk = _round_up(max(_LANE, min(tk, _round_up(K, _LANE))), _LANE)
        Kp = _round_up(K, tk)

        x2 = x.reshape(B, K)                                                  # row-major == torch .view
        x2 = jnp.pad(x2, ((0, Bp - B), (0, Kp - K))).astype(mm_dtype)
        w = jnp.pad(w, ((0, Kp - K), (0, 0))).astype(mm_dtype)

        out = pl.pallas_call(
            _fc_flatten_kernel,
            out_shape=jax.ShapeDtypeStruct((Bp, Cp), jnp.float32),
            grid=(Bp // tb, Kp // tk),
            in_specs=[
                pl.BlockSpec((tb, tk), lambda i, k: (i, k)),   # activations
                pl.BlockSpec((tk, Cp), lambda i, k: (k, 0)),   # weight slab
                pl.BlockSpec((1, Cp), lambda i, k: (0, 0)),    # bias (resident)
            ],
            out_specs=pl.BlockSpec((tb, Cp), lambda i, k: (i, 0)),
            scratch_shapes=[pltpu.VMEM((tb, Cp), jnp.float32)],
            compiler_params=pltpu.CompilerParams(
                dimension_semantics=("parallel", "arbitrary")),
        )(x2, w, b)

    elif preprocess == "mean":
        assert weight.shape[1] == E, (weight.shape, E)
        x3 = jnp.pad(x, ((0, Bp - B), (0, 0), (0, 0))).astype(mm_dtype)
        w = w.astype(mm_dtype)                                                # [E, Cp]

        out = pl.pallas_call(
            functools.partial(_fc_mean_kernel, inv_tokens=1.0 / T),
            out_shape=jax.ShapeDtypeStruct((Bp, Cp), jnp.float32),
            grid=(Bp // tb,),
            in_specs=[
                pl.BlockSpec((tb, T, E), lambda i: (i, 0, 0)),  # full (T, E) tile
                pl.BlockSpec((E, Cp), lambda i: (0, 0)),        # resident weights
                pl.BlockSpec((1, Cp), lambda i: (0, 0)),        # bias
            ],
            out_specs=pl.BlockSpec((tb, Cp), lambda i: (i, 0)),
            compiler_params=pltpu.CompilerParams(
                dimension_semantics=("parallel",)),
        )(x3, w, b)
    else:
        raise ValueError(f"unknown preprocess: {preprocess}")

    return out[:B, :C]


# ---------------------------------------------------------------------------
# Demo / self-check
# ---------------------------------------------------------------------------
if __name__ == "__main__":
    B, T, E = 2, 32, 160        # batch, token_num, emb_dim (module defaults)
    C = 13                      # num_classes

    key = jax.random.PRNGKey(0)
    kx, kw, kb = jax.random.split(key, 3)
    x = jax.random.normal(kx, (B, T, E), jnp.float32)

    # ---- preprocess='flatten' (module default) ----
    Kf = T * E
    w_flat = 0.02 * jax.random.normal(kw, (C, Kf), jnp.float32)   # [out, in] (torch layout)
    b_flat = 0.02 * jax.random.normal(kb, (C,), jnp.float32)

    logits = fc_classifier_forward(x, w_flat, b_flat, preprocess="flatten")
    logits = jax.block_until_ready(logits)
    ref = x.reshape(B, -1) @ w_flat.T + b_flat
    assert logits.shape == (B, C), logits.shape
    assert bool(jnp.all(jnp.isfinite(logits)))
    assert bool(jnp.allclose(logits, ref, rtol=5e-2, atol=5e-2))

    # ---- preprocess='mean' ----
    w_mean = 0.1 * jax.random.normal(kw, (C, E), jnp.float32)
    b_mean = 0.1 * jax.random.normal(kb, (C,), jnp.float32)

    logits_m = fc_classifier_forward(x, w_mean, b_mean, preprocess="mean")
    logits_m = jax.block_until_ready(logits_m)
    ref_m = x.mean(axis=1) @ w_mean.T + b_mean
    assert logits_m.shape == (B, C), logits_m.shape
    assert bool(jnp.all(jnp.isfinite(logits_m)))
    assert bool(jnp.allclose(logits_m, ref_m, rtol=5e-2, atol=5e-2))

    print("KERNEL_OK")
</pallas_src>

<mosaic_0001>
module attributes {stable_mosaic.version = 11 : i64} {
  func.func @_fc_flatten_kernel(%arg0: i32, %arg1: i32, %arg2: memref<8x1280xbf16, #tpu.memory_space<vmem>>, %arg3: memref<1280x128xbf16, #tpu.memory_space<vmem>>, %arg4: memref<1x128xf32, #tpu.memory_space<vmem>>, %arg5: memref<8x128xf32, #tpu.memory_space<vmem>>, %arg6: memref<8x128xf32, #tpu.memory_space<vmem>>) attributes {dimension_semantics = [#tpu.dimension_semantics<parallel>, #tpu.dimension_semantics<arbitrary>], iteration_bounds = array<i64: 1, 4>, scalar_prefetch = 0 : i64, scratch_operands = 1 : i64, tpu.core_type = #tpu.core_type<tc>, window_params = [{transform_indices = @transform_0, window_bounds = array<i64: 8, 1280>}, {transform_indices = @transform_1, window_bounds = array<i64: 1280, 128>}, {pipeline_mode = #tpu.pipeline_mode<synchronous>, transform_indices = @transform_2, window_bounds = array<i64: 1, 128>}, {transform_indices = @transform_3, window_bounds = array<i64: 8, 128>}]} {
    %c0_i32 = arith.constant 0 : i32
    %0 = arith.cmpi eq, %arg1, %c0_i32 : i32
    %1 = arith.extui %0 : i1 to i32
    %c0_i32_0 = arith.constant 0 : i32
    %2 = arith.cmpi ne, %1, %c0_i32_0 : i32
    scf.if %2 {
      %cst_9 = arith.constant 0.000000e+00 : f32
      %12 = vector.broadcast %cst_9 : f32 to vector<8x128xf32>
      %c0_10 = arith.constant 0 : index
      %c0_11 = arith.constant 0 : index
      %13 = vector.load %arg6[%c0_10, %c0_11] : memref<8x128xf32, #tpu.memory_space<vmem>>, vector<8x128xf32>
      tpu.vector_store %arg6[%c0_10, %c0_11], %12 {strides = array<i32>} : memref<8x128xf32, #tpu.memory_space<vmem>>, vector<8x128xf32>,
    } else {
    }
    %c0 = arith.constant 0 : index
    %c0_1 = arith.constant 0 : index
    %3 = vector.load %arg6[%c0, %c0_1] : memref<8x128xf32, #tpu.memory_space<vmem>>, vector<8x128xf32>
    %c0_2 = arith.constant 0 : index
    %c0_3 = arith.constant 0 : index
    %4 = vector.load %arg2[%c0_2, %c0_3] : memref<8x1280xbf16, #tpu.memory_space<vmem>>, vector<8x1280xbf16>
    %c0_4 = arith.constant 0 : index
    %c0_5 = arith.constant 0 : index
    %5 = vector.load %arg3[%c0_4, %c0_5] : memref<1280x128xbf16, #tpu.memory_space<vmem>>, vector<1280x128xbf16>
    %cst = arith.constant dense<0.000000e+00> : vector<8x128xf32>
    %6 = tpu.matmul %4, %5, %cst {dimension_numbers = #tpu.dot_dimension_numbers<[1], [0], [0], [1], [0, 0, 1, 1], [], []>} : vector<8x1280xbf16>, vector<1280x128xbf16>, vector<8x128xf32> -> vector<8x128xf32>
    %7 = arith.addf %3, %6 : vector<8x128xf32>
    %c0_6 = arith.constant 0 : index
    %c0_7 = arith.constant 0 : index
    %8 = vector.load %arg6[%c0_6, %c0_7] : memref<8x128xf32, #tpu.memory_space<vmem>>, vector<8x128xf32>
    tpu.vector_store %arg6[%c0_6, %c0_7], %7 {strides = array<i32>} : memref<8x128xf32, #tpu.memory_space<vmem>>, vector<8x128xf32>,
    %c3_i32 = arith.constant 3 : i32
    %9 = arith.cmpi eq, %arg1, %c3_i32 : i32
    %10 = arith.extui %9 : i1 to i32
    %c0_i32_8 = arith.constant 0 : i32
    %11 = arith.cmpi ne, %10, %c0_i32_8 : i32
    scf.if %11 {
      %c0_9 = arith.constant 0 : index
      %c0_10 = arith.constant 0 : index
      %12 = vector.load %arg6[%c0_9, %c0_10] : memref<8x128xf32, #tpu.memory_space<vmem>>, vector<8x128xf32>
      %c0_11 = arith.constant 0 : index
      %c0_12 = arith.constant 0 : index
      %13 = vector.load %arg4[%c0_11, %c0_12] : memref<1x128xf32, #tpu.memory_space<vmem>>, vector<1x128xf32>
      %14 = vector.broadcast %13 : vector<1x128xf32> to vector<8x128xf32>
      %15 = arith.addf %12, %14 : vector<8x128xf32>
      %c0_13 = arith.constant 0 : index
      %c0_14 = arith.constant 0 : index
      %16 = vector.load %arg5[%c0_13, %c0_14] : memref<8x128xf32, #tpu.memory_space<vmem>>, vector<8x128xf32>
      tpu.vector_store %arg5[%c0_13, %c0_14], %15 {strides = array<i32>} : memref<8x128xf32, #tpu.memory_space<vmem>>, vector<8x128xf32>,
    } else {
    }
    return
  }
  func.func @transform_0(%arg0: i32, %arg1: i32) -> (i32, i32) {
    %c0_i32 = arith.constant 0 : i32
    return %arg0, %arg1 : i32, i32
  }
  func.func @transform_1(%arg0: i32, %arg1: i32) -> (i32, i32) {
    %c0_i32 = arith.constant 0 : i32
    %c0_i32_0 = arith.constant 0 : i32
    return %arg1, %c0_i32 : i32, i32
  }
  func.func @transform_2(%arg0: i32, %arg1: i32) -> (i32, i32) {
    %c0_i32 = arith.constant 0 : i32
    %c0_i32_0 = arith.constant 0 : i32
    %c0_i32_1 = arith.constant 0 : i32
    return %c0_i32, %c0_i32_0 : i32, i32
  }
  func.func @transform_3(%arg0: i32, %arg1: i32) -> (i32, i32) {
    %c0_i32 = arith.constant 0 : i32
    %c0_i32_0 = arith.constant 0 : i32
    return %arg0, %c0_i32 : i32, i32
  }
}

</mosaic_0001>

<bundles_post_ra>
// kernel: tpu_custom_call.1
= control target key start
LH: loop header
LB: loop body
LE: loop exit
PB: predicated region body
PF: predicated region fallthrough
CT: control target
= control target key end

     0   :  { %8 = vsyncpa [#allocation4], 0  ;;  %s2186_s0 = inlined_call_operand.hbm [shape: bf16[8,5120], index: 0, kind: input, shape index: {}]   ;;  %s2187_s1 = inlined_call_operand.hbm [shape: bf16[5120,128], index: 1, kind: input, shape index: {}]   ;;  %s2188_s2 = inlined_call_operand.hbm [shape: f32[1,128], index: 2, kind: input, shape index: {}]   ;;  %s2189_s3 = inlined_call_operand.hbm [shape: f32[8,128], index: 3, kind: output, shape index: {}]  }
   0x1   :  { %10 = vsyncpa [#allocation4 + $0x1], 0 }
   0x2   :  { %11 = vsyncpa [#allocation7], 0 }
   0x3   :  { %13 = vsyncpa [#allocation7 + $0x1], 0 }
   0x4   :  { %14 = vsyncpa [#allocation5], 0  ;;  %s1855_s12 = smov 0   ;;  %s1857_s13 = smov 0  }
   0x5   :  { %s1859_s14 = smov 0   ;;  %s1861_s15 = smov 0  }
   0x6   :  { %s1863_s16 = smov 0   ;;  %s1865_s17 = smov 0  }
   0x7 LB: > { %s1884_s18 = sadd.s32 4294967295, %s1826_s17   ;;  %s41_s19 = sadd.s32 1, %s1814_s14  ;;  %s1826_s17 = sphi %s1865_s17, %s20_s17   ;;  %s1822_s16 = sphi %s1863_s16, %s2210_s16   ;;  %s1818_s15 = sphi %s1861_s15, %s2209_s15   ;;  %s1814_s14 = sphi %s1859_s14, %s2208_s14   ;;  %s1810_s13 = sphi %s1857_s13, %s2207_s13   ;;  %s1806_s12 = sphi %s1855_s12, %s2206_s12  }
   0x8   : > { %p48_p0 = scmp.ne.s32.totalorder %s1814_s14, %s1810_s13  ;;  %p54_p1 = scmp.ne.s32.totalorder %s1810_s13, %s1806_s12 }
   0x9   : > { %p2190_p2 = scmp.eq.s32.totalorder %s1884_s18, 0  ;;  %p1259_p3 = scmp.ge.s32.totalorder %s1826_s17, 1 }
   0xa   : > { %p138_p4 = scmp.lt.s32.totalorder %s1826_s17, 5  ;;  %s1828_s22 = smov [#allocation8]  }
   0xb   : > { %p1895_p5 = por %p2190_p2, %p54_p1  ;;  %s151_s23 = sshll.u32 %s1828_s22, 4  ;;  %s152_s23 = int_to_ptr.vmem [resolvable:$true] %s151_s23 }
   0xc   : > { %p1899_p6 = pnand %p1259_p3, %p138_p4  ;;  %p49_p8 = scmp.eq.s32.totalorder %s1826_s17, 0 }
   0xd   : > { %s2193_s20 = scalar_select %p1895_p5, 1, 0 }
   0xe   : > { %s2194_s21 = scalar_select %p1899_p6, 1, 0 }
   0xf   : > { %p1491_p7 = pneg %p1899_p6  ;;  %s29_s25 = sadd.s32 1, %s1822_s16 }
  0x10   : > { %p1913_p10 = scmp.ge.s32.totalorder %s29_s25, 4  ;;  %p1920_p11 = por %p49_p8, %p48_p0 }
  0x11   : > { %p1908_p9 = pnand %p1491_p7, %p2190_p2  ;;  %s1650_s30 = scalar_lea.hbm %s2188_s2, 16 }
  0x12   : > { %s2196_s26 = scalar_select %p1913_p10, 1, 0 }
  0x13   : > { %s2197_s27 = scalar_select %p1920_p11, 1, 0 }
  0x14   : > { %p1651_p13 = scmp.ne.s32.totalorder %s2188_s2, %s1650_s30  ;;  %p1652_p1 = pneg %p1908_p9 }
  0x15   : > { %p1657_p0 = scmp.lt.u32.totalorder %s1650_s30, %s2188_s2 }
  0x16   : > { %p1653_p3 = pnand %p1652_p1, %p1651_p13 }
  0x18   : > { %p1654_p4 = pneg %p1653_p3 }
  0x1a   : > { %p1659_p7 = pnand %p1657_p0, %p1654_p4 }
  0x1c   : > { %1662 = shalt.err (!%p1659_p7)
}
  0x1d   : > { %s1663_s8 = scalar_lea.vmem %s152_s23, 16  ;;  %s1670_s9 = scalar_lea.vmem %s152_s23, 32 }
  0x1e   : > { %p1664_p8 = scmp.ne.s32.totalorder %s152_s23, %s1663_s8  ;;  %p1671_p5 = scmp.lt.s32.totalorder %s152_s23, %s152_s23 }
  0x1f   : > { %p1672_p6 = scmp.lt.s32.totalorder %s1670_s9, %s1663_s8 }
  0x20   : > { %p1666_p2 = pnand %p1664_p8, %p1652_p1 }
  0x21   : > { %p1673_p11 = por %p1672_p6, %p1671_p5 }
  0x22   : > { %p1667_p12 = pneg %p1666_p2 }
  0x24   : > { %p1674_p10 = pnand %p1673_p11, %p1667_p12 }
  0x26   : > { %1677 = shalt.err (!%p1674_p10)
}
  0x27   : > { %1494 = dma.hbm_to_vmem [thread:$0]  (!%p1908_p9), %s2188_s2, 16, %s152_s23, [#allocation7]  }
  0x28   : > { %p2198_p2 = scmp.ne.s32.totalorder %s2196_s26, 0  ;;  %s1946_s12 = sand.u32 1, %s1814_s14  }
  0x29   : > { %s1363_s22 = smul.u32 640, %s1822_s16  ;;  %p2199_p6 = scmp.ne.s32.totalorder %s2197_s27, 0 }
  0x2a   : > { %s2212_s25 = smov (%p2198_p2, %s29_s25), 0  ;;  %s1475_s28 = smul.u32 40, %s1946_s12 }
  0x2b   : > { %s37_s24 = ssub.s32 %s1822_s16, %s2212_s25  ;;  %s1955_s4 = scalar_lea.hbm %s2186_s0, %s1363_s22 }
  0x2c   : > { %p39_p5 = scmp.eq.s32.totalorder %s37_s24, 0  ;;  %p2200_p9 = scmp.lt.s32.totalorder %s1826_s17, 4 }
  0x2d   : > { %s166_s5 = scalar_lea.vmem [#allocation3], %s1475_s28  ;;  %s1476_s7 = smul.u32 640, %s1946_s12 }
  0x2e   : > { %p1961_p10 = pnand %p2200_p9, %p2199_p6  ;;  %s176_s6 = sshll.u32 %s166_s5, 4  ;;  %s1971_s6 = int_to_ptr.vmem [resolvable:$true] %s176_s6 }
  0x2f   : > { %s1968_s26 = scalar_select %p39_p5, %s1814_s14, %s41_s19  }
  0x30   : > { %s1364_s27 = smul.u32 10240, %s1822_s16  ;;  %s163_s8 = scalar_lea.sflag [#allocation4], %s1946_s12 }
  0x31   : > { %s1678_s9 = scalar_lea.hbm %s1955_s4, 640  ;;  %p1680_p12 = pneg %p1961_p10 }
  0x32   : > { %p1679_p11 = scmp.ne.s32.totalorder %s1955_s4, %s1678_s9  ;;  %s1683_s19 = scalar_lea.hbm %s2186_s0, 2560 }
  0x33   : > { %p1684_p3 = scmp.lt.u32.totalorder %s1955_s4, %s2186_s0  ;;  %p1685_p4 = scmp.lt.u32.totalorder %s1683_s19, %s1678_s9 }
  0x34   : > { %p1681_p13 = pnand %p1680_p12, %p1679_p11  ;;  %p1687_p7 = scmp.lt.u32.totalorder %s1678_s9, %s1955_s4 }
  0x35   : > { %p1686_p0 = por %p1685_p4, %p1684_p3 }
  0x36   : > { %p1682_p1 = pneg %p1681_p13 }
  0x37   : > { %p1688_p8 = por %p1687_p7, %p1686_p0 }
  0x39   : > { %p1689_p2 = pnand %p1688_p8, %p1682_p1 }
  0x3b   : > { %1692 = shalt.err (!%p1689_p2)
}
  0x3c   : > { %s1693_s28 = scalar_lea.vmem %s1971_s6, 640  ;;  %s1829_s29 = smov [#allocation3]  }
  0x3d   : > { %p1694_p5 = scmp.ne.s32.totalorder %s1971_s6, %s1693_s28  ;;  %s1698_s30 = sshll.u32 %s1829_s29, 4  ;;  %s1699_s30 = int_to_ptr.vmem [resolvable:$false] %s1698_s30 }
  0x3e   : > { %s1700_s5 = scalar_lea.vmem %s1699_s30, 1280  ;;  %p1701_p11 = scmp.lt.s32.totalorder %s1971_s6, %s1699_s30 }
  0x3f   : > { %p1696_p6 = pnand %p1694_p5, %p1680_p12  ;;  %p1702_p13 = scmp.lt.s32.totalorder %s1700_s5, %s1693_s28 }
  0x41   : > { %p1697_p9 = pneg %p1696_p6  ;;  %p1703_p3 = por %p1702_p13, %p1701_p11 }
  0x43   : > { %p1704_p4 = pnand %p1703_p3, %p1697_p9 }
  0x45   : > { %1707 = shalt.err (!%p1704_p4)
}
  0x46   : > { %1498 = dma.hbm_to_vmem [thread:$0]  (!%p1961_p10), %s1955_s4, 640, %s1971_s6, %s163_s8  }
  0x47   : > { %s183_s9 = sand.u32 1, %s1826_s17   ;;  %s187_s10 = scalar_lea.vmem [#allocation6], %s1476_s7 }
  0x48   : > { %s194_s11 = sshll.u32 %s187_s10, 4  ;;  %s2010_s24 = scalar_lea.hbm %s2187_s1, %s1364_s27  ;;  %s2003_s11 = int_to_ptr.vmem [resolvable:$true] %s194_s11 }
  0x49   : > { %s2012_s28 = scalar_lea.sflag [#allocation7], %s183_s9  ;;  %s1708_s29 = scalar_lea.hbm %s2010_s24, 10240 }
  0x4a   : > { %p1709_p1 = scmp.ne.s32.totalorder %s2010_s24, %s1708_s29  ;;  %s1713_s6 = scalar_lea.hbm %s2187_s1, 40960 }
  0x4b   : > { %p1714_p8 = scmp.lt.u32.totalorder %s2010_s24, %s2187_s1  ;;  %p1715_p2 = scmp.lt.u32.totalorder %s1713_s6, %s1708_s29 }
  0x4c   : > { %p1711_p0 = pnand %p1709_p1, %p1680_p12  ;;  %p1717_p6 = scmp.lt.u32.totalorder %s1708_s29, %s2010_s24 }
  0x4d   : > { %p1716_p5 = por %p1715_p2, %p1714_p8 }
  0x4e   : > { %p1712_p7 = pneg %p1711_p0 }
  0x4f   : > { %p1718_p9 = por %p1717_p6, %p1716_p5 }
  0x51   : > { %p1719_p11 = pnand %p1718_p9, %p1712_p7 }
  0x53   : > { %1722 = shalt.err (!%p1719_p11)
}
  0x54   : > { %s1723_s27 = scalar_lea.vmem %s2003_s11, 10240  ;;  %s1830_s30 = smov [#allocation6]  }
  0x55   : > { %p1724_p13 = scmp.ne.s32.totalorder %s2003_s11, %s1723_s27  ;;  %s1728_s5 = sshll.u32 %s1830_s30, 4  ;;  %s1729_s5 = int_to_ptr.vmem [resolvable:$false] %s1728_s5 }
  0x56   : > { %s1730_s9 = scalar_lea.vmem %s1729_s5, 20480  ;;  %p1731_p1 = scmp.lt.s32.totalorder %s2003_s11, %s1729_s5 }
  0x57   : > { %p1726_p3 = pnand %p1724_p13, %p1680_p12  ;;  %p1732_p0 = scmp.lt.s32.totalorder %s1730_s9, %s1723_s27 }
  0x59   : > { %p1727_p4 = pneg %p1726_p3  ;;  %p1733_p8 = por %p1732_p0, %p1731_p1 }
  0x5b   : > { %p1734_p2 = pnand %p1733_p8, %p1727_p4 }
  0x5d   : > { %1737 = shalt.err (!%p1734_p2)
}
  0x5e   : > { %s1831_s10 = smov 64   ;;  %s1832_s19 = smov 4  }
  0x5f   : > { %1501 = dma.hbm_to_vmem [thread:$0]  (!%p1961_p10), %s2010_s24, 10240, %s2003_s11, %s2012_s28, %s1831_s10, %s1831_s10, %s1832_s19  }
  0x60   : > { %p2202_p12 = scmp.ne.s32.totalorder %s2194_s21, 0 }
  0x61   : > { %s208_s22 = sand.u32 (!%p2202_p12), 1, %s1810_s13   ;;  %p2203_p7 = scmp.ne.s32.totalorder (!%p2202_p12), %s2193_s20, 0 }
  0x62   : > { %206 = sbr.rel (%p2202_p12) target bundleno = 475 (0x1db), region = 32  ;;  %s209_s12 = scalar_lea.sflag (!%p2202_p12), [#allocation4], %s208_s22 }
  0x63   : > { %s1477_s29 = smul.u32 (!%p2202_p12), 40, %s208_s22 }
  0x65   : > { %s2041_s4 = scalar_lea.vmem (!%p2202_p12), [#allocation3], %s1477_s29 }
  0x69   : > { %1789 = dma.done.wait (%p2203_p7), %s209_s12, 640  }
  0x6a   : > { %1791 = vsyncadd (%p2203_p7), %s209_s12, 4294966656  ;;  %s217_s6 = sand.u32 1, %s1884_s18   ;;  %s1478_s23 = smul.u32 640, %s208_s22 }
  0x6b   : > { %s218_s11 = scalar_lea.sflag [#allocation7], %s217_s6 }
  0x6c   : > { %s2048_s24 = scalar_lea.vmem [#allocation6], %s1478_s23 }
  0x6d   : > { %1793 = dma.done.wait (%p2203_p7), %s218_s11, 10240  }
  0x6e   : > { %1795 = vsyncadd (%p2203_p7), %s218_s11, 4294957056  ;;  %p2204_p10 = scmp.eq.s32.totalorder %s1884_s18, 0 }
  0x70   : > { %1797 = dma.done.wait (%p2204_p10), [#allocation7], 16   ;;  %p2205_p5 = pmov %p2204_p10 }
  0x71   : > { %p1266_p6 = scmp.ne.s32.totalorder %s1818_s15, 0 }
  0x72   : > { %1799 = vsyncadd (%p2205_p5), [#allocation7], 4294967280  ;;  %v1833_v0 = vmov (!%p1266_p6), 0.0  }
  0x73   : > { %254 = sbr.rel (%p1266_p6) target bundleno = 122 (0x7a), region = 48  ;;  %255 = vst [vmem:[#allocation2] sm:$0xff] (!%p1266_p6), %v1833_v0 }
  0x7a PF: > { %v1560_v1 = vld [vmem:[%s2048_s24 + $0x40] sm:$0xff]   ;;  %v1564_v5 = vld [vmem:[%s2048_s24 + $0x48] sm:$0xff]   ;;  %v1568_v9 = vld [vmem:[%s2048_s24 + $0x50] sm:$0xff]   ;;  %p1357_p9 = scmp.ne.s32.totalorder %s1818_s15, 3 }
  0x7b   : > { %v1561_v2 = vld [vmem:[%s2048_s24 + $0xc0] sm:$0xff]   ;;  %1365 = vmatprep.subr.bf16.mxu0 %v1560_v1  ;;  %v1565_v6 = vld [vmem:[%s2048_s24 + $0xc8] sm:$0xff]   ;;  %v1569_v10 = vld [vmem:[%s2048_s24 + $0xd0] sm:$0xff]  }
  0x7c   : > { %v1562_v3 = vld [vmem:[%s2048_s24] sm:$0xff]   ;;  %1387 = vmatprep.subr.bf16.mxu1 %v1561_v2  ;;  %v1566_v7 = vld [vmem:[%s2048_s24 + $0x8] sm:$0xff]   ;;  %v1570_v11 = vld [vmem:[%s2048_s24 + $0x10] sm:$0xff]  }
  0x7d   : > { %v1563_v4 = vld [vmem:[%s2048_s24 + $0x80] sm:$0xff]   ;;  %1366 = vmatpush3.bf16.msra.mxu0 %v1562_v3  ;;  %v1567_v8 = vld [vmem:[%s2048_s24 + $0x88] sm:$0xff]   ;;  %v1571_v12 = vld [vmem:[%s2048_s24 + $0x90] sm:$0xff]  }
  0x7e   : > { %1388 = vmatpush3.bf16.msra.mxu1 %v1563_v4  ;;  %1367 = vmatprep.subr.bf16.mxu0 %v1564_v5  ;;  %v1572_v13 = vld [vmem:[%s2048_s24 + $0x58] sm:$0xff]   ;;  %v1576_v17 = vld [vmem:[%s2048_s24 + $0x60] sm:$0xff]   ;;  %v1580_v21 = vld [vmem:[%s2048_s24 + $0x68] sm:$0xff]  }
  0x7f   : > { %1389 = vmatprep.subr.bf16.mxu1 %v1565_v6  ;;  %v1573_v14 = vld [vmem:[%s2048_s24 + $0xd8] sm:$0xff]   ;;  %v1577_v18 = vld [vmem:[%s2048_s24 + $0xe0] sm:$0xff]   ;;  %v1581_v22 = vld [vmem:[%s2048_s24 + $0xe8] sm:$0xff]  }
  0x80   : > { %v1574_v15 = vld [vmem:[%s2048_s24 + $0x18] sm:$0xff]   ;;  %v1578_v19 = vld [vmem:[%s2048_s24 + $0x20] sm:$0xff]   ;;  %v1582_v23 = vld [vmem:[%s2048_s24 + $0x28] sm:$0xff]  }
  0x81   : > { %1368 = vmatpush3.bf16.msra.mxu0 %v1566_v7  ;;  %v1575_v16 = vld [vmem:[%s2048_s24 + $0x98] sm:$0xff]   ;;  %v1579_v20 = vld [vmem:[%s2048_s24 + $0xa0] sm:$0xff]   ;;  %v1583_v24 = vld [vmem:[%s2048_s24 + $0xa8] sm:$0xff]  }
  0x82   : > { %1390 = vmatpush3.bf16.msra.mxu1 %v1567_v8  ;;  %1369 = vmatprep.subr.bf16.mxu0 %v1568_v9  ;;  %v1584_v25 = vld [vmem:[%s2048_s24 + $0x70] sm:$0xff]   ;;  %v1588_v29 = vld [vmem:[%s2048_s24 + $0x78] sm:$0xff]   ;;  %v1596_v39 = vld [vmem:[%s2048_s24 + $0x140] sm:$0xff]  }
  0x83   : > { %1391 = vmatprep.subr.bf16.mxu1 %v1569_v10  ;;  %v1585_v26 = vld [vmem:[%s2048_s24 + $0xf0] sm:$0xff]   ;;  %v1589_v30 = vld [vmem:[%s2048_s24 + $0xf8] sm:$0xff]   ;;  %v1597_v40 = vld [vmem:[%s2048_s24 + $0x100] sm:$0xff]  }
  0x84   : > { %v1586_v27 = vld [vmem:[%s2048_s24 + $0x30] sm:$0xff]   ;;  %v1590_v31 = vld [vmem:[%s2048_s24 + $0x38] sm:$0xff]   ;;  %v1598_v41 = vld [vmem:[%s2048_s24 + $0x1c0] sm:$0xff]  }
  0x85   : > { %1370 = vmatpush3.bf16.msra.mxu0 %v1570_v11  ;;  %v1587_v28 = vld [vmem:[%s2048_s24 + $0xb0] sm:$0xff]   ;;  %v1591_v32 = vld [vmem:[%s2048_s24 + $0xb8] sm:$0xff]   ;;  %v1599_v42 = vld [vmem:[%s2048_s24 + $0x180] sm:$0xff]  }
  0x86   : > { %1392 = vmatpush3.bf16.msra.mxu1 %v1571_v12  ;;  %1371 = vmatprep.subr.bf16.mxu0 %v1572_v13  ;;  %v257_v33 = vld [vmem:[%s2041_s4] sm:$0xff]  ;;  %v258_v34 = vld [vmem:[%s2041_s4 + $0x8] sm:$0xff]  ;;  %v1600_v43 = vld [vmem:[%s2048_s24 + $0x148] sm:$0xff]  }
  0x87   : > { %1393 = vmatprep.subr.bf16.mxu1 %v1573_v14  ;;  %v1267_v35 = vcombine.low %v257_v33, %v257_v33  ;;  %v1268_v36 = vcombine.high %v257_v33, %v257_v33  ;;  %v1269_v37 = vcombine.low %v258_v34, %v258_v34  ;;  %v1270_v38 = vcombine.high %v258_v34, %v258_v34  ;;  %v1601_v44 = vld [vmem:[%s2048_s24 + $0x108] sm:$0xff]   ;;  %v1604_v47 = vld [vmem:[%s2048_s24 + $0x150] sm:$0xff]   ;;  %v1608_v51 = vld [vmem:[%s2048_s24 + $0x158] sm:$0xff]  }
  0x88   : > { %v1602_v45 = vld [vmem:[%s2048_s24 + $0x1c8] sm:$0xff]   ;;  %v1605_v48 = vld [vmem:[%s2048_s24 + $0x110] sm:$0xff]   ;;  %v1609_v52 = vld [vmem:[%s2048_s24 + $0x118] sm:$0xff]  }
  0x89   : > { %1372 = vmatpush3.bf16.msra.mxu0 %v1574_v15  ;;  %969 = vmatprep.mubr.bf16.mxu0 %v1268_v36  ;;  %v1603_v46 = vld [vmem:[%s2048_s24 + $0x188] sm:$0xff]   ;;  %v1606_v49 = vld [vmem:[%s2048_s24 + $0x1d0] sm:$0xff]   ;;  %v1610_v53 = vld [vmem:[%s2048_s24 + $0x1d8] sm:$0xff]  }
  0x8a   : > { %1394 = vmatpush3.bf16.msra.mxu1 %v1575_v16  ;;  %1373 = vmatprep.subr.bf16.mxu0 %v1576_v17  ;;  %v1607_v50 = vld [vmem:[%s2048_s24 + $0x190] sm:$0xff]   ;;  %v1611_v54 = vld [vmem:[%s2048_s24 + $0x198] sm:$0xff]   ;;  %v1612_v55 = vld [vmem:[%s2048_s24 + $0x160] sm:$0xff]  }
  0x8b   : > { %1395 = vmatprep.subr.bf16.mxu1 %v1577_v18  ;;  %1009 = vmatprep.mubr.bf16.mxu1 %v1270_v38  ;;  %v1613_v56 = vld [vmem:[%s2048_s24 + $0x120] sm:$0xff]   ;;  %v1616_v59 = vld [vmem:[%s2048_s24 + $0x168] sm:$0xff]   ;;  %v1620_v63 = vld [vmem:[%s2048_s24 + $0x170] sm:$0xff]  }
  0x8c   : > { %v1614_v57 = vld [vmem:[%s2048_s24 + $0x1e0] sm:$0xff]   ;;  %v1617_v60 = vld [vmem:[%s2048_s24 + $0x128] sm:$0xff]   ;;  %v1621_v0 = vld [vmem:[%s2048_s24 + $0x130] sm:$0xff]  }
  0x8d   : > { %1374 = vmatpush3.bf16.msra.mxu0 %v1578_v19  ;;  %v1615_v58 = vld [vmem:[%s2048_s24 + $0x1a0] sm:$0xff]   ;;  %v1618_v61 = vld [vmem:[%s2048_s24 + $0x1e8] sm:$0xff]   ;;  %v1622_v1 = vld [vmem:[%s2048_s24 + $0x1f0] sm:$0xff]  }
  0x8e   : > { %1396 = vmatpush3.bf16.msra.mxu1 %v1579_v20  ;;  %1375 = vmatprep.subr.bf16.mxu0 %v1580_v21  ;;  %v1619_v62 = vld [vmem:[%s2048_s24 + $0x1a8] sm:$0xff]   ;;  %v1623_v2 = vld [vmem:[%s2048_s24 + $0x1b0] sm:$0xff]   ;;  %v1624_v3 = vld [vmem:[%s2048_s24 + $0x178] sm:$0xff]  }
  0x8f   : > { %1397 = vmatprep.subr.bf16.mxu1 %v1581_v22  ;;  %v1625_v4 = vld [vmem:[%s2048_s24 + $0x138] sm:$0xff]   ;;  %v259_v6 = vld [vmem:[%s2041_s4 + $0x10] sm:$0xff]  ;;  %v260_v11 = vld [vmem:[%s2041_s4 + $0x18] sm:$0xff] }
  0x90   : > { %v1626_v5 = vld [vmem:[%s2048_s24 + $0x1f8] sm:$0xff]   ;;  %v1272_v7 = vcombine.high %v259_v6, %v259_v6  ;;  %v1271_v9 = vcombine.low %v259_v6, %v259_v6  ;;  %v1630_v10 = vld [vmem:[%s2048_s24 + $0x240] sm:$0xff]   ;;  %v1273_v12 = vcombine.low %v260_v11, %v260_v11  ;;  %v1274_v13 = vcombine.high %v260_v11, %v260_v11  ;;  %v1634_v15 = vld [vmem:[%s2048_s24 + $0x248] sm:$0xff]  }
  0x91   : > { %1376 = vmatpush3.bf16.msra.mxu0 %v1582_v23  ;;  %v1629_v8 = vld [vmem:[%s2048_s24 + $0x1b8] sm:$0xff]   ;;  %v1633_v14 = vld [vmem:[%s2048_s24 + $0x200] sm:$0xff]   ;;  %v1635_v16 = vld [vmem:[%s2048_s24 + $0x208] sm:$0xff]  }
  0x92   : > { %1398 = vmatpush3.bf16.msra.mxu1 %v1583_v24  ;;  %1377 = vmatprep.subr.bf16.mxu0 %v1584_v25  ;;  %v1636_v17 = vld [vmem:[%s2048_s24 + $0x250] sm:$0xff]   ;;  %v1638_v19 = vld [vmem:[%s2048_s24 + $0x258] sm:$0xff]   ;;  %v1640_v21 = vld [vmem:[%s2048_s24 + $0x260] sm:$0xff]  }
  0x93   : > { %1399 = vmatprep.subr.bf16.mxu1 %v1585_v26  ;;  %v1637_v18 = vld [vmem:[%s2048_s24 + $0x210] sm:$0xff]   ;;  %v1639_v20 = vld [vmem:[%s2048_s24 + $0x218] sm:$0xff]   ;;  %v1641_v23 = vld [vmem:[%s2048_s24 + $0x220] sm:$0xff]  }
  0x94   : > { %v261_v22 = vld [vmem:[%s2041_s4 + $0x20] sm:$0xff]  ;;  %v1642_v25 = vld [vmem:[%s2048_s24 + $0x268] sm:$0xff]  }
  0x95   : > { %1378 = vmatpush3.bf16.msra.mxu0 %v1586_v27  ;;  %v1276_v24 = vcombine.high %v261_v22, %v261_v22  ;;  %v1643_v26 = vld [vmem:[%s2048_s24 + $0x228] sm:$0xff]   ;;  %v1644_v27 = vld [vmem:[%s2048_s24 + $0x270] sm:$0xff]  }
  0x96   : > { %1400 = vmatpush3.bf16.msra.mxu1 %v1587_v28  ;;  %1379 = vmatprep.subr.bf16.mxu0 %v1588_v29  ;;  %v1645_v28 = vld [vmem:[%s2048_s24 + $0x230] sm:$0xff]   ;;  %v1646_v29 = vld [vmem:[%s2048_s24 + $0x278] sm:$0xff]  }
  0x97   : > { %1401 = vmatprep.subr.bf16.mxu1 %v1589_v30  ;;  %v1647_v30 = vld [vmem:[%s2048_s24 + $0x238] sm:$0xff]  }
  0x99   : > { %1380 = vmatpush3.bf16.msra.mxu0 %v1590_v31  ;;  %v1275_v31 = vcombine.low %v261_v22, %v261_v22 }
  0x9a   : > { %1402 = vmatpush3.bf16.msra.mxu1 %v1591_v32  ;;  %1409 = vmatprep.subr.bf16.mxu0 %v1596_v39 }
  0x9b   : > { %1431 = vmatprep.subr.bf16.mxu1 %v1598_v41 }
  0x9c   : > { %970 = vmatmul.mubr.bf16.vlgmr.msra.gmra.mrb[0].mxu0 %v1267_v35 }
  0x9d   : > { %1010 = vmatmul.mubr.bf16.vlgmr.msra.gmra.mrb[0].mxu1 %v1269_v37  ;;  %1410 = vmatpush3.bf16.msra.mxu0 %v1597_v40 }
  0x9e   : > { %1432 = vmatpush3.bf16.msra.mxu1 %v1599_v42  ;;  %1411 = vmatprep.subr.bf16.mxu0 %v1600_v43 }
  0x9f   : > { %1433 = vmatprep.subr.bf16.mxu1 %v1602_v45  ;;  %1049 = vmatprep.mubr.bf16.mxu0 %v1272_v7 }
  0xa0   : > { %1089 = vmatprep.mubr.bf16.mxu1 %v1274_v13 }
  0xa1   : > { %1412 = vmatpush3.bf16.msra.mxu0 %v1601_v44 }
  0xa2   : > { %1434 = vmatpush3.bf16.msra.mxu1 %v1603_v46  ;;  %1413 = vmatprep.subr.bf16.mxu0 %v1604_v47 }
  0xa3   : > { %1435 = vmatprep.subr.bf16.mxu1 %v1606_v49 }
  0xa5   : > { %1414 = vmatpush3.bf16.msra.mxu0 %v1605_v48 }
  0xa6   : > { %1436 = vmatpush3.bf16.msra.mxu1 %v1607_v50  ;;  %1415 = vmatprep.subr.bf16.mxu0 %v1608_v51 }
  0xa7   : > { %1437 = vmatprep.subr.bf16.mxu1 %v1610_v53 }
  0xa9   : > { %1416 = vmatpush3.bf16.msra.mxu0 %v1609_v52 }
  0xaa   : > { %1438 = vmatpush3.bf16.msra.mxu1 %v1611_v54  ;;  %1417 = vmatprep.subr.bf16.mxu0 %v1612_v55 }
  0xab   : > { %1439 = vmatprep.subr.bf16.mxu1 %v1614_v57 }
  0xad   : > { %1418 = vmatpush3.bf16.msra.mxu0 %v1613_v56 }
  0xae   : > { %1440 = vmatpush3.bf16.msra.mxu1 %v1615_v58  ;;  %1419 = vmatprep.subr.bf16.mxu0 %v1616_v59  ;;  %v256_v59 = vld [vmem:[#allocation2] sm:$0xff] }
  0xaf   : > { %1441 = vmatprep.subr.bf16.mxu1 %v1618_v61 }
  0xb1   : > { %1420 = vmatpush3.bf16.msra.mxu0 %v1617_v60 }
  0xb2   : > { %1442 = vmatpush3.bf16.msra.mxu1 %v1619_v62  ;;  %1421 = vmatprep.subr.bf16.mxu0 %v1620_v63 }
  0xb3   : > { %1443 = vmatprep.subr.bf16.mxu1 %v1622_v1 }
  0xb5   : > { %1422 = vmatpush3.bf16.msra.mxu0 %v1621_v0  ;;  %v1358_v0 = vld [vmem:[#allocation8] ss:$0 sm:$0xff] (!%p1357_p9) }
  0xb6   : > { %1444 = vmatpush3.bf16.msra.mxu1 %v1623_v2  ;;  %1423 = vmatprep.subr.bf16.mxu0 %v1624_v3 }
  0xb7   : > { %1445 = vmatprep.subr.bf16.mxu1 %v1626_v5 }
  0xb9   : > { %1424 = vmatpush3.bf16.msra.mxu0 %v1625_v4 }
  0xba   : > { %1446 = vmatpush3.bf16.msra.mxu1 %v1629_v8  ;;  %1453 = vmatprep.subr.bf16.mxu0 %v1630_v10 }
  0xbc   : > { %1050 = vmatmul.mubr.bf16.vlgmr.msra.gmra.mrb[4].mxu0 %v1271_v9 }
  0xbd   : > { %1454 = vmatpush3.bf16.msra.mxu0 %v1633_v14  ;;  %1090 = vmatmul.mubr.bf16.vlgmr.msra.gmra.mrb[4].mxu1 %v1273_v12 }
  0xbe   : > { %1455 = vmatprep.subr.bf16.mxu0 %v1634_v15  ;;  %1129 = vmatprep.mubr.bf16.mxu0 %v1276_v24 }
  0xc1   : > { %1456 = vmatpush3.bf16.msra.mxu0 %v1635_v16 }
  0xc2   : > { %1457 = vmatprep.subr.bf16.mxu0 %v1636_v17 }
  0xc5   : > { %1458 = vmatpush3.bf16.msra.mxu0 %v1637_v18 }
  0xc6   : > { %1459 = vmatprep.subr.bf16.mxu0 %v1638_v19 }
  0xc9   : > { %1460 = vmatpush3.bf16.msra.mxu0 %v1639_v20 }
  0xca   : > { %1461 = vmatprep.subr.bf16.mxu0 %v1640_v21 }
  0xcd   : > { %1462 = vmatpush3.bf16.msra.mxu0 %v1641_v23 }
  0xce   : > { %1463 = vmatprep.subr.bf16.mxu0 %v1642_v25 }
  0xd1   : > { %1464 = vmatpush3.bf16.msra.mxu0 %v1643_v26 }
  0xd2   : > { %1465 = vmatprep.subr.bf16.mxu0 %v1644_v27 }
  0xd5   : > { %1466 = vmatpush3.bf16.msra.mxu0 %v1645_v28 }
  0xd6   : > { %1467 = vmatprep.subr.bf16.mxu0 %v1646_v29 }
  0xd9   : > { %1468 = vmatpush3.bf16.msra.mxu0 %v1647_v30 }
  0xdc   : > { %1130 = vmatmul.mubr.bf16.vlgmr.msra.gmra.mrb[8].mxu0 %v1275_v31 }
 0x16f   : > { %v1381_v32 = vpop.f32.mrb[0].mxu0 }
 0x170   : > { %v1403_v33 = vpop.f32.mrb[0].mxu1  ;;  %v1382_v34 = vpop.f32.mrb[1].mxu0 }
 0x171   : > { %v1404_v35 = vpop.f32.mrb[1].mxu1  ;;  %v1383_v36 = vadd.f32 %v1382_v34, %v1381_v32  ;;  %v1384_v38 = vpop.f32.mrb[2].mxu0 }
 0x172   : > { %v1405_v37 = vadd.f32 %v1404_v35, %v1403_v33  ;;  %v1406_v39 = vpop.f32.mrb[2].mxu1  ;;  %v1385_v40 = vpop.f32.mrb[3].mxu0 }
 0x173   : > { %v1407_v41 = vpop.f32.mrb[3].mxu1 }
 0x174   : > { %v1012_v42 = vadd.f32 %v1405_v37, %v1383_v36 }
 0x18f   : > { %v1425_v43 = vpop.f32.mrb[4].mxu0 }
 0x190   : > { %v1426_v44 = vpop.f32.mrb[5].mxu0  ;;  %v1447_v45 = vpop.f32.mrb[4].mxu1 }
 0x191   : > { %v1427_v46 = vadd.f32 %v1426_v44, %v1425_v43  ;;  %v1428_v47 = vpop.f32.mrb[6].mxu0  ;;  %v1448_v48 = vpop.f32.mrb[5].mxu1 }
 0x192   : > { %v1429_v49 = vpop.f32.mrb[7].mxu0  ;;  %v1449_v50 = vadd.f32 %v1448_v48, %v1447_v45  ;;  %v1450_v51 = vpop.f32.mrb[6].mxu1 }
 0x193   : > { %v1052_v52 = vadd.f32 %v1427_v46, %v1012_v42  ;;  %v1451_v53 = vpop.f32.mrb[7].mxu1 }
 0x195   : > { %v1092_v54 = vadd.f32 %v1449_v50, %v1052_v52 }
 0x1af   : > { %v1469_v55 = vpop.f32.mrb[8].mxu0 }
 0x1b0   : > { %v1470_v56 = vpop.f32.mrb[9].mxu0 }
 0x1b1   : > { %v1471_v57 = vadd.f32 %v1470_v56, %v1469_v55  ;;  %v1472_v58 = vpop.f32.mrb[10].mxu0  ;;  %1142 = sbr.rel (%p1357_p9) target bundleno = 450 (0x1c2), region = 52 }
 0x1b2   : > { %v1473_v60 = vpop.f32.mrb[11].mxu0 }
 0x1b3   : > { %v1132_v61 = vadd.f32 %v1471_v57, %v1092_v54 }
 0x1b5   : > { %v1137_v62 = vadd.f32 %v1132_v61, %v256_v59 }
 0x1b7   : > { %1138 = vst [vmem:[#allocation2] sm:$0xff] %v1137_v62 }
 0x1be   : > { %v1143_v63 = vld [vmem:[#allocation2] sm:$0xff] }
 0x1bf   : > { %v1151_v1 = vadd.f32 %v1358_v0, %v1143_v63 }
 0x1c1   : > { %1152 = vst [vmem:[#allocation9] sm:$0xff] %v1151_v1 }
 0x1c2 PF: > { %p1505_p11 = scmp.eq.s32.totalorder %s1884_s18, 3  ;;  %s1834_s20 = smov [#allocation9]  }
 0x1c3   : > { %s1162_s21 = sshll.u32 %s1834_s20, 4  ;;  %s1163_s21 = int_to_ptr.vmem [resolvable:$true] %s1162_s21 }
 0x1c4   : > { %s1738_s28 = scalar_lea.vmem %s1163_s21, 128  ;;  %p1745_p1 = scmp.lt.s32.totalorder %s1163_s21, %s1163_s21 }
 0x1c5   : > { %p1739_p13 = scmp.ne.s32.totalorder %s1163_s21, %s1738_s28  ;;  %p1746_p0 = scmp.lt.s32.totalorder %s1738_s28, %s1738_s28 }
 0x1c7   : > { %p1740_p3 = pnand %p1739_p13, %p1505_p11  ;;  %p1747_p8 = por %p1746_p0, %p1745_p1 }
 0x1c9   : > { %p1741_p4 = pneg %p1740_p3 }
 0x1cb   : > { %p1748_p2 = pnand %p1747_p8, %p1741_p4 }
 0x1cd   : > { %1751 = shalt.err (!%p1748_p2)
}
 0x1ce   : > { %s1752_s8 = scalar_lea.hbm %s2189_s3, 128 }
 0x1cf   : > { %p1753_p12 = scmp.ne.s32.totalorder %s2189_s3, %s1752_s8  ;;  %p1758_p5 = scmp.lt.u32.totalorder %s1752_s8, %s2189_s3 }
 0x1d1   : > { %p1754_p7 = pnand %p1753_p12, %p1505_p11 }
 0x1d3   : > { %p1755_p10 = pneg %p1754_p7 }
 0x1d5   : > { %p1760_p6 = pnand %p1758_p5, %p1755_p10 }
 0x1d7   : > { %1763 = shalt.err (!%p1760_p6)
}
 0x1d8   : > { %1488 = dma.vmem_to_hbm [thread:$0]  (%p1505_p11), %s1163_s21, 128, %s2189_s3, [#allocation5]  }
 0x1d9   : > { %1801 = dma.done.wait (%p1505_p11), [#allocation5], 128  }
 0x1da   : > { %1803 = vsyncadd (%p1505_p11), [#allocation5], 4294967168 }
 0x1db PF: > { %s20_s17 = sadd.s32 1, %s1826_s17   ;;  %s2206_s12 = smov %s1810_s13 }
 0x1dc   : > { %p17_p9 = scmp.ge.s32.totalorder %s20_s17, 6   ;;  %s2207_s13 = smov %s1814_s14 }
 0x1dd   : > { %s2208_s14 = smov %s1968_s26  ;;  %s2209_s15 = smov %s1822_s16 }
 0x1de   : > { %s2210_s16 = smov %s2212_s25  ;;  %19 = sbr.rel (!%p17_p9) target bundleno = 7 (0x7), region = 95 }
 0x1e5   :  { %1175 = vsyncpa [#allocation4], 1 }
 0x1e6   :  { %1177 = vsyncpa [#allocation4 + $0x1], 1 }
 0x1e7   :  { %1178 = vsyncpa [#allocation7], 1 }
 0x1e8   :  { %1180 = vsyncpa [#allocation7 + $0x1], 1 }
 0x1e9   :  { %1181 = vsyncpa [#allocation5], 1 }
 0x1ea   :  { %1183 = vsyncpa [#allocation5 + $0x1], 1 }

</bundles_post_ra>
